<compile_context>
chip_gen: v7x
topology: tpu7x:2x2x1
jax: 0.10.0
libtpu: 0.0.40
codegen_flags: <defaults>
</compile_context>

<pallas_src>
import functools

import jax
import jax.numpy as jnp
from jax import lax
from jax.experimental import pallas as pl
from jax.experimental.pallas import tpu as pltpu

# Synthetic physical constants (deterministic, in-script).
MU = 3.986004418e5       # gravitational parameter (scaled units)
R_REF = 16000.0          # ScaleNNPotential(2, 16000.0, 0.0, True)
R2_EPS = 1e-12           # numerical guard for r^2 (spec has r_min = 0)

LANE = 128               # lane width; bump to 256 on v6e/v7x if matmul-bound


def _round_up(v, m):
    return ((v + m - 1) // m) * m


def gaiknet_kernel(x_ref, w_ref, b_ref, out_ref, *, n_pad):
    """Fused GAIKnet forward for one batch tile.

    x_ref   : [BT, 3*n_pad]      flattened coordinates [x(n_pad), y(..), z(..)]
    w_ref   : [3*n_pad, n_pad]   folded fc weight (group-sum + padding applied)
    b_ref   : [1, n_pad]         folded fc bias
    out_ref : [BT, n_pad]        boundary-enforced potential (lane-dense)
    """
    # Ref slices are zero-cost views; every slice is 128-lane / 8-sublane
    # aligned (n_pad is a multiple of 128).
    xc = x_ref[:, 0:n_pad]
    yc = x_ref[:, n_pad:2 * n_pad]
    zc = x_ref[:, 2 * n_pad:3 * n_pad]

    # Cart2_Pines_Sph_Layer + Inv_R_Layer: direction cosines scaled by 1/r
    # -> features (x/r^2, y/r^2, z/r^2).
    r2 = jnp.maximum(xc * xc + yc * yc + zc * zc, R2_EPS)
    r_inv = lax.rsqrt(r2)                 # 1/r   (EUP)
    r = jnp.sqrt(r2)                      # r     (EUP; matches reference sqrt)
    r_inv2 = r_inv * r_inv                # 1/r^2

    # fc + AnalyticModelLayer NN branch: the 4-group sum over the fc output is
    # pre-folded into w_ref/b_ref in the wrapper, so this yields u_nn directly.
    # Three matmuls against ref-level weight slices summed into one f32
    # accumulator (no concatenate / [BT, 3*n_pad] relayout in VMEM).
    # TODO(synk): exact AnalyticModelLayer semantics unavailable in source.
    u_nn = jnp.dot(xc * r_inv2, w_ref[0:n_pad, :],
                   preferred_element_type=jnp.float32)
    u_nn = u_nn + jnp.dot(yc * r_inv2, w_ref[n_pad:2 * n_pad, :],
                          preferred_element_type=jnp.float32)
    u_nn = u_nn + jnp.dot(zc * r_inv2, w_ref[2 * n_pad:3 * n_pad, :],
                          preferred_element_type=jnp.float32)
    u_nn = u_nn + b_ref[...]              # [BT, n_pad]

    # AnalyticModelLayer analytic branch: point-mass potential.
    u_an = -MU * r_inv                    # [BT, n_pad]

    # ScaleNNPotential(power=2, r_ref=16000, r_min=0, trainable=True):
    # enforce (r_ref/r)^2 radial decay of the NN correction.
    scale = (R_REF * R_REF) * r_inv2
    u = u_nn * scale + u_an

    # EnforceBoundaryConditions: smooth blend to the analytic model outside
    # the reference radius.
    # TODO(synk): exact EnforceBoundaryConditions semantics unavailable.
    w_bc = 0.5 * (1.0 + jnp.tanh((r - R_REF) / R_REF))
    out_ref[...] = (1.0 - w_bc) * u + w_bc * u_an


def prepare_gaiknet_params(w_fc, b_fc, N):
    """Fold the AnalyticModelLayer 4-group sum into the fc parameters and pad.

    Static per-model work (mathematically exact fold): call once, reuse the
    returned arrays across every forward call.
      w_fc : [4N, 3N] torch nn.Linear weight layout;  b_fc : [4N].
    Returns (w_kern [3*n_pad, n_pad], b_kern [1, n_pad], n_pad).
    """
    n_pad = _round_up(N, LANE)

    w_t = jnp.transpose(w_fc).astype(jnp.float32)               # [3N, 4N]
    w_eff = (w_t[:, 0:N] + w_t[:, N:2 * N]
             + w_t[:, 2 * N:3 * N] + w_t[:, 3 * N:4 * N])       # [3N, N]
    b_eff = (b_fc[0:N] + b_fc[N:2 * N]
             + b_fc[2 * N:3 * N] + b_fc[3 * N:4 * N]).astype(jnp.float32)

    if n_pad == N:
        w_kern = w_eff
        b_kern = b_eff.reshape(1, N)
    else:
        # Pad weight rows per coordinate group and columns to n_pad (zeros),
        # so padded points/outputs contribute nothing.
        w_grp = w_eff.reshape(3, N, N)
        w_kern = (jnp.zeros((3, n_pad, n_pad), jnp.float32)
                  .at[:, :N, :N].set(w_grp)
                  .reshape(3 * n_pad, n_pad))
        b_kern = jnp.zeros((1, n_pad), jnp.float32).at[0, :N].set(b_eff)
    return w_kern, b_kern, n_pad


def gaiknet_forward(x, w_kern, b_kern, N):
    """x: [B, 3, N] f32;  (w_kern, b_kern, n_pad) from prepare_gaiknet_params."""
    B, three, N_in = x.shape
    assert three == 3 and N_in == N
    n_pad = w_kern.shape[1]

    # ---- batch tile: as large as VMEM comfortably allows (per-step overhead
    # ~0.35 us; the kernel is HBM-bound at small/medium n_pad). ----
    if n_pad <= 512:
        bt_cap = 512
    elif n_pad <= 1024:
        bt_cap = 256
    else:
        bt_cap = 128
    bt = min(bt_cap, _round_up(B, 8))
    b_pad = _round_up(B, bt)
    # v7x has 2 TensorCores: keep >= 2 batch tiles so the "parallel" grid axis
    # can shard work across both (only when the batch is big enough to matter).
    if b_pad // bt == 1 and bt >= 64 and bt % 16 == 0:
        bt //= 2
        b_pad = _round_up(B, bt)
    n_steps = b_pad // bt

    # ---- coordinates: avoid the full pad+copy when no padding is needed. ----
    if N == n_pad and B == b_pad:
        x_flat = x.reshape(B, 3 * N)                    # contiguous, no copy
    elif N == n_pad:
        x_flat = jnp.pad(x.reshape(B, 3 * N), ((0, b_pad - B), (0, 0)))
    else:
        x_pad = (jnp.zeros((b_pad, 3, n_pad), jnp.float32)
                 .at[:B, :, :N].set(x))
        x_flat = x_pad.reshape(b_pad, 3 * n_pad)

    # ---- VMEM budget: double-buffered x/out tiles + single-buffered W/b. ----
    vmem_need = 4 * (2 * bt * 3 * n_pad        # x tiles (2 buffers)
                     + 2 * bt * n_pad          # out tiles (2 buffers)
                     + 3 * n_pad * n_pad       # resident weight (1 buffer)
                     + n_pad)                  # bias
    vmem_limit = int(min(96 << 20, max(16 << 20, int(vmem_need * 1.5))))

    cost = pl.CostEstimate(
        flops=2 * b_pad * 3 * n_pad * n_pad,
        transcendentals=3 * b_pad * n_pad,     # rsqrt + sqrt + tanh per elem
        bytes_accessed=4 * (b_pad * 3 * n_pad + 3 * n_pad * n_pad
                            + n_pad + b_pad * n_pad),
    )

    kernel = functools.partial(gaiknet_kernel, n_pad=n_pad)
    out_pad = pl.pallas_call(
        kernel,
        out_shape=jax.ShapeDtypeStruct((b_pad, n_pad), jnp.float32),
        grid=(n_steps,),
        in_specs=[
            pl.BlockSpec((bt, 3 * n_pad), lambda i: (i, 0)),
            # Constant index_maps -> resident across batch tiles; no prefetch
            # overlap needed, so keep a single buffer (halves weight VMEM).
            pl.BlockSpec((3 * n_pad, n_pad), lambda i: (0, 0),
                         pipeline_mode=pl.Buffered(1)),
            pl.BlockSpec((1, n_pad), lambda i: (0, 0),
                         pipeline_mode=pl.Buffered(1)),
        ],
        out_specs=pl.BlockSpec((bt, n_pad), lambda i: (i, 0)),
        compiler_params=pltpu.CompilerParams(
            dimension_semantics=("parallel",),
            vmem_limit_bytes=vmem_limit),
        cost_estimate=cost,
    )(x_flat, w_kern, b_kern)

    return out_pad[:B, :N]


def gaiknet_reference(x, w_fc, b_fc):
    """Pure-JAX reference (same semantics, no padding/fusion)."""
    B, _, N = x.shape
    xc, yc, zc = x[:, 0, :], x[:, 1, :], x[:, 2, :]
    r2 = jnp.maximum(xc * xc + yc * yc + zc * zc, R2_EPS)
    r = jnp.sqrt(r2)
    feat = jnp.concatenate([xc / r2, yc / r2, zc / r2], axis=1)   # [B, 3N]
    h = feat @ jnp.transpose(w_fc) + b_fc                         # [B, 4N]
    u_nn = h[:, 0:N] + h[:, N:2 * N] + h[:, 2 * N:3 * N] + h[:, 3 * N:4 * N]
    u_an = -MU / r
    u = u_nn * (R_REF / r) ** 2 + u_an
    w_bc = 0.5 * (1.0 + jnp.tanh((r - R_REF) / R_REF))
    return (1.0 - w_bc) * u + w_bc * u_an


if __name__ == "__main__":
    B, N = 8, 8            # small shapes: batch=8, N=8 -> fc is 24 -> 32

    key = jax.random.PRNGKey(0)
    k_dir, k_rad, k_w, k_b = jax.random.split(key, 4)

    # Positions with radii well away from zero (1000 .. 20000 units).
    direction = jax.random.normal(k_dir, (B, 3, N), dtype=jnp.float32)
    direction = direction / jnp.linalg.norm(direction, axis=1, keepdims=True)
    radii = jax.random.uniform(k_rad, (B, 1, N), minval=1000.0, maxval=20000.0)
    x = (direction * radii).astype(jnp.float32)

    # Deterministic fc parameters (torch nn.Linear-style uniform init).
    fan_in = 3 * N
    bound = 1.0 / jnp.sqrt(jnp.float32(fan_in))
    w_fc = jax.random.uniform(
        k_w, (4 * N, 3 * N), minval=-bound, maxval=bound, dtype=jnp.float32)
    b_fc = jax.random.uniform(
        k_b, (4 * N,), minval=-bound, maxval=bound, dtype=jnp.float32)

    # Static parameter fold/pad (once per model), then the fused forward.
    w_kern, b_kern, _ = prepare_gaiknet_params(w_fc, b_fc, N)
    out = gaiknet_forward(x, w_kern, b_kern, N)
    out = jax.block_until_ready(out)

    ref = gaiknet_reference(x, w_fc, b_fc)
    assert out.shape == (B, N)
    assert bool(jnp.all(jnp.isfinite(out)))
    assert bool(jnp.allclose(out, ref, rtol=1e-4, atol=1e-3))
    print("KERNEL_OK")
</pallas_src>

<mosaic_0001>
module attributes {stable_mosaic.version = 11 : i64} {
  func.func @gaiknet_kernel(%arg0: i32, %arg1: memref<8x384xf32, #tpu.memory_space<vmem>>, %arg2: memref<384x128xf32, #tpu.memory_space<vmem>>, %arg3: memref<1x128xf32, #tpu.memory_space<vmem>>, %arg4: memref<8x128xf32, #tpu.memory_space<vmem>>) attributes {dimension_semantics = [#tpu.dimension_semantics<parallel>], iteration_bounds = array<i64: 1>, scalar_prefetch = 0 : i64, scratch_operands = 0 : i64, tpu.core_type = #tpu.core_type<tc>, window_params = [{transform_indices = @transform_0, window_bounds = array<i64: 8, 384>}, {pipeline_mode = #tpu.pipeline_mode<synchronous>, transform_indices = @transform_1, window_bounds = array<i64: 384, 128>}, {pipeline_mode = #tpu.pipeline_mode<synchronous>, transform_indices = @transform_2, window_bounds = array<i64: 1, 128>}, {transform_indices = @transform_3, window_bounds = array<i64: 8, 128>}]} {
    %c0 = arith.constant 0 : index
    %c0_0 = arith.constant 0 : index
    %0 = vector.load %arg1[%c0, %c0_0] : memref<8x384xf32, #tpu.memory_space<vmem>>, vector<8x128xf32>
    %c0_1 = arith.constant 0 : index
    %c128 = arith.constant 128 : index
    %1 = vector.load %arg1[%c0_1, %c128] : memref<8x384xf32, #tpu.memory_space<vmem>>, vector<8x128xf32>
    %c0_2 = arith.constant 0 : index
    %c256 = arith.constant 256 : index
    %2 = vector.load %arg1[%c0_2, %c256] : memref<8x384xf32, #tpu.memory_space<vmem>>, vector<8x128xf32>
    %3 = arith.mulf %0, %0 : vector<8x128xf32>
    %4 = arith.mulf %1, %1 : vector<8x128xf32>
    %5 = arith.addf %3, %4 : vector<8x128xf32>
    %6 = arith.mulf %2, %2 : vector<8x128xf32>
    %7 = arith.addf %5, %6 : vector<8x128xf32>
    %cst = arith.constant 9.99999996E-13 : f32
    %8 = vector.broadcast %cst : f32 to vector<8x128xf32>
    %9 = arith.maximumf %7, %8 : vector<8x128xf32>
    %10 = math.rsqrt %9 : vector<8x128xf32>
    %11 = math.sqrt %9 : vector<8x128xf32>
    %12 = arith.mulf %10, %10 : vector<8x128xf32>
    %13 = arith.mulf %0, %12 : vector<8x128xf32>
    %c0_3 = arith.constant 0 : index
    %c0_4 = arith.constant 0 : index
    %14 = vector.load %arg2[%c0_3, %c0_4] : memref<384x128xf32, #tpu.memory_space<vmem>>, vector<128x128xf32>
    %cst_5 = arith.constant dense<0.000000e+00> : vector<8x128xf32>
    %15 = tpu.matmul %13, %14, %cst_5 {dimension_numbers = #tpu.dot_dimension_numbers<[1], [0], [0], [1], [0, 0, 1, 1], [], []>} : vector<8x128xf32>, vector<128x128xf32>, vector<8x128xf32> -> vector<8x128xf32>
    %16 = arith.mulf %1, %12 : vector<8x128xf32>
    %c128_6 = arith.constant 128 : index
    %c0_7 = arith.constant 0 : index
    %17 = vector.load %arg2[%c128_6, %c0_7] : memref<384x128xf32, #tpu.memory_space<vmem>>, vector<128x128xf32>
    %cst_8 = arith.constant dense<0.000000e+00> : vector<8x128xf32>
    %18 = tpu.matmul %16, %17, %cst_8 {dimension_numbers = #tpu.dot_dimension_numbers<[1], [0], [0], [1], [0, 0, 1, 1], [], []>} : vector<8x128xf32>, vector<128x128xf32>, vector<8x128xf32> -> vector<8x128xf32>
    %19 = arith.addf %15, %18 : vector<8x128xf32>
    %20 = arith.mulf %2, %12 : vector<8x128xf32>
    %c256_9 = arith.constant 256 : index
    %c0_10 = arith.constant 0 : index
    %21 = vector.load %arg2[%c256_9, %c0_10] : memref<384x128xf32, #tpu.memory_space<vmem>>, vector<128x128xf32>
    %cst_11 = arith.constant dense<0.000000e+00> : vector<8x128xf32>
    %22 = tpu.matmul %20, %21, %cst_11 {dimension_numbers = #tpu.dot_dimension_numbers<[1], [0], [0], [1], [0, 0, 1, 1], [], []>} : vector<8x128xf32>, vector<128x128xf32>, vector<8x128xf32> -> vector<8x128xf32>
    %23 = arith.addf %19, %22 : vector<8x128xf32>
    %c0_12 = arith.constant 0 : index
    %c0_13 = arith.constant 0 : index
    %24 = vector.load %arg3[%c0_12, %c0_13] : memref<1x128xf32, #tpu.memory_space<vmem>>, vector<1x128xf32>
    %25 = vector.broadcast %24 : vector<1x128xf32> to vector<8x128xf32>
    %26 = arith.addf %23, %25 : vector<8x128xf32>
    %cst_14 = arith.constant -398600.438 : f32
    %27 = vector.broadcast %cst_14 : f32 to vector<8x128xf32>
    %28 = arith.mulf %27, %10 : vector<8x128xf32>
    %cst_15 = arith.constant 2.560000e+08 : f32
    %29 = vector.broadcast %cst_15 : f32 to vector<8x128xf32>
    %30 = arith.mulf %29, %12 : vector<8x128xf32>
    %31 = arith.mulf %26, %30 : vector<8x128xf32>
    %32 = arith.addf %31, %28 : vector<8x128xf32>
    %cst_16 = arith.constant 1.600000e+04 : f32
    %33 = vector.broadcast %cst_16 : f32 to vector<8x128xf32>
    %34 = arith.subf %11, %33 : vector<8x128xf32>
    %cst_17 = arith.constant 1.600000e+04 : f32
    %35 = vector.broadcast %cst_17 : f32 to vector<8x128xf32>
    %36 = arith.divf %34, %35 : vector<8x128xf32>
    %37 = math.tanh %36 : vector<8x128xf32>
    %cst_18 = arith.constant 1.000000e+00 : f32
    %38 = vector.broadcast %cst_18 : f32 to vector<8x128xf32>
    %39 = arith.addf %38, %37 : vector<8x128xf32>
    %cst_19 = arith.constant 5.000000e-01 : f32
    %40 = vector.broadcast %cst_19 : f32 to vector<8x128xf32>
    %41 = arith.mulf %40, %39 : vector<8x128xf32>
    %cst_20 = arith.constant 1.000000e+00 : f32
    %42 = vector.broadcast %cst_20 : f32 to vector<8x128xf32>
    %43 = arith.subf %42, %41 : vector<8x128xf32>
    %44 = arith.mulf %43, %32 : vector<8x128xf32>
    %45 = arith.mulf %41, %28 : vector<8x128xf32>
    %46 = arith.addf %44, %45 : vector<8x128xf32>
    %c0_21 = arith.constant 0 : index
    %c0_22 = arith.constant 0 : index
    %47 = vector.load %arg4[%c0_21, %c0_22] : memref<8x128xf32, #tpu.memory_space<vmem>>, vector<8x128xf32>
    tpu.vector_store %arg4[%c0_21, %c0_22], %46 {strides = array<i32>} : memref<8x128xf32, #tpu.memory_space<vmem>>, vector<8x128xf32>,
    return
  }
  func.func @transform_0(%arg0: i32) -> (i32, i32) {
    %c0_i32 = arith.constant 0 : i32
    %c0_i32_0 = arith.constant 0 : i32
    return %arg0, %c0_i32 : i32, i32
  }
  func.func @transform_1(%arg0: i32) -> (i32, i32) {
    %c0_i32 = arith.constant 0 : i32
    %c0_i32_0 = arith.constant 0 : i32
    %c0_i32_1 = arith.constant 0 : i32
    return %c0_i32, %c0_i32_0 : i32, i32
  }
  func.func @transform_2(%arg0: i32) -> (i32, i32) {
    %c0_i32 = arith.constant 0 : i32
    %c0_i32_0 = arith.constant 0 : i32
    %c0_i32_1 = arith.constant 0 : i32
    return %c0_i32, %c0_i32_0 : i32, i32
  }
  func.func @transform_3(%arg0: i32) -> (i32, i32) {
    %c0_i32 = arith.constant 0 : i32
    %c0_i32_0 = arith.constant 0 : i32
    return %arg0, %c0_i32 : i32, i32
  }
}

</mosaic_0001>

<bundles_post_ra>
// kernel: tpu_custom_call.1
= control target key start
LH: loop header
LB: loop body
LE: loop exit
PB: predicated region body
PF: predicated region fallthrough
CT: control target
= control target key end

     0   :  { %8 = vsyncpa [#allocation3], 0  ;;  %s808_s0 = inlined_call_operand.hbm [shape: f32[8,384], index: 0, kind: input, shape index: {}]   ;;  %s809_s1 = inlined_call_operand.hbm [shape: f32[384,128], index: 1, kind: input, shape index: {}]   ;;  %s810_s2 = inlined_call_operand.vmem [shape: f32[1,128], index: 2, kind: input, shape index: {}]   ;;  %s811_s3 = inlined_call_operand.hbm [shape: f32[8,128], index: 3, kind: output, shape index: {}]  }
   0x1   :  { %9 = vsyncpa [#allocation6], 0 }
   0x2   :  { %10 = vsyncpa [#allocation4], 0  ;;  %s674_s12 = smov [#allocation2]   ;;  %s675_s14 = smov [#allocation5]  }
   0x3   :  { %s17_s13 = sshll.u32 %s674_s12, 4  ;;  %s26_s15 = sshll.u32 %s675_s14, 4  ;;  %s18_s13 = int_to_ptr.vmem [resolvable:$true] %s17_s13  ;;  %s702_s15 = int_to_ptr.vmem [resolvable:$true] %s26_s15 }
   0x4   :  { %s602_s18 = scalar_lea.hbm %s808_s0, 384 }
   0x5   :  { %p603_p0 = scmp.ne.s32.totalorder %s808_s0, %s602_s18  ;;  %p606_p1 = scmp.lt.u32.totalorder %s602_s18, %s808_s0 }
   0x7   :  { %p608_p2 = pnand %p606_p1, %p603_p0 }
   0x9   :  { %611 = shalt.err (!%p608_p2)
}
   0xa   :  { %s612_s23 = scalar_lea.vmem %s18_s13, 384  ;;  %p617_p4 = scmp.lt.s32.totalorder %s18_s13, %s18_s13 }
   0xb   :  { %p613_p3 = scmp.ne.s32.totalorder %s18_s13, %s612_s23  ;;  %p618_p5 = scmp.lt.s32.totalorder %s612_s23, %s612_s23 }
   0xd   :  { %p619_p6 = por %p618_p5, %p617_p4 }
   0xf   :  { %p620_p7 = pnand %p619_p6, %p613_p3 }
  0x11   :  { %623 = shalt.err (!%p620_p7)
}
  0x12   :  { %20 = dma.hbm_to_vmem [thread:$0]  %s808_s0, 384, %s18_s13, [#allocation3]  }
  0x13   :  { %s624_s28 = scalar_lea.hbm %s809_s1, 6144 }
  0x14   :  { %p625_p8 = scmp.ne.s32.totalorder %s809_s1, %s624_s28  ;;  %p628_p9 = scmp.lt.u32.totalorder %s624_s28, %s809_s1 }
  0x16   :  { %p630_p10 = pnand %p628_p9, %p625_p8 }
  0x18   :  { %633 = shalt.err (!%p630_p10)
}
  0x19   :  { %s634_s6 = scalar_lea.vmem %s702_s15, 6144  ;;  %p639_p12 = scmp.lt.s32.totalorder %s702_s15, %s702_s15 }
  0x1a   :  { %p635_p11 = scmp.ne.s32.totalorder %s702_s15, %s634_s6  ;;  %p640_p13 = scmp.lt.s32.totalorder %s634_s6, %s634_s6 }
  0x1c   :  { %p641_p0 = por %p640_p13, %p639_p12 }
  0x1e   :  { %p642_p1 = pnand %p641_p0, %p635_p11 }
  0x20   :  { %645 = shalt.err (!%p642_p1)
}
  0x21   :  { %s676_s0 = smov 128   ;;  %s677_s7 = smov 8  }
  0x22   :  { %32 = dma.hbm_to_vmem [thread:$0]  %s809_s1, 6144, %s702_s15, [#allocation6], %s676_s0, %s676_s0, %s677_s7  }
  0x23   :  { %668 = dma.done.wait [#allocation3], 384  }
  0x24   :  { %669 = vsyncadd [#allocation3], 4294966912 }
  0x25   :  { %670 = dma.done.wait [#allocation6], 6144  }
  0x26   :  { %671 = vsyncadd [#allocation6], 4294961152  ;;  %v678_v0 = vmov 0.0|0.0   ;;  %vm679_vm0 = vmmov 0   ;;  %v680_v1 = vmov 0.0   ;;  %v77_v2 = vld [vmem:[#allocation5 + $0x80] sm:$0xff] }
  0x27   :  { %518 = vmatprep.subr.bf16.mxu0 %v678_v0  ;;  %542 = vmatprep.subr.bf16.mxu1 %v678_v0  ;;  %v78_v3 = vld [vmem:[#allocation5 + $0x88] sm:$0xff]  ;;  %v60_v4 = vld [vmem:[#allocation5] sm:$0xff]  ;;  %v79_v7 = vld [vmem:[#allocation5 + $0x90] sm:$0xff]  ;;  %s681_s11 = smov [#allocation7]  }
  0x28   :  { %445 = vmatprep.mubr.msk.f32.mxu0 %vm679_vm0, %v680_v1  ;;  %480 = vmatprep.mubr.msk.f32.mxu1 %vm679_vm0, %v680_v1  ;;  %v519_v5 = vpack.c.bf16 %v78_v3, %v77_v2  ;;  %v61_v6 = vld [vmem:[#allocation5 + $0x8] sm:$0xff]  ;;  %v80_v8 = vld [vmem:[#allocation5 + $0x98] sm:$0xff]  ;;  %v62_v10 = vld [vmem:[#allocation5 + $0x10] sm:$0xff]  ;;  %s350_s12 = sshll.u32 %s681_s11, 4  ;;  %s351_s12 = int_to_ptr.vmem [resolvable:$true] %s350_s12 }
  0x29   :  { %v543_v9 = vpack.c.bf16 %v61_v6, %v60_v4  ;;  %v63_v11 = vld [vmem:[#allocation5 + $0x18] sm:$0xff]  ;;  %v522_v12 = vpack.c.bf16 %v80_v8, %v79_v7  ;;  %v81_v14 = vld [vmem:[#allocation5 + $0xa0] sm:$0xff]  ;;  %v82_v15 = vld [vmem:[#allocation5 + $0xa8] sm:$0xff]  ;;  %s646_s13 = scalar_lea.vmem %s351_s12, 128  ;;  %p651_p3 = scmp.lt.s32.totalorder %s351_s12, %s351_s12 }
  0x2a   :  { %520 = vmatpush3.bf16.msra.mxu0 %v519_v5  ;;  %v546_v13 = vpack.c.bf16 %v63_v11, %v62_v10  ;;  %v64_v16 = vld [vmem:[#allocation5 + $0x20] sm:$0xff]  ;;  %v65_v17 = vld [vmem:[#allocation5 + $0x28] sm:$0xff]  ;;  %v525_v18 = vpack.c.bf16 %v82_v15, %v81_v14  ;;  %v83_v20 = vld [vmem:[#allocation5 + $0xb0] sm:$0xff]  ;;  %p647_p2 = scmp.ne.s32.totalorder %s351_s12, %s646_s13  ;;  %p652_p4 = scmp.lt.s32.totalorder %s646_s13, %s646_s13 }
  0x2b   :  { %544 = vmatpush3.bf16.msra.mxu1 %v543_v9  ;;  %521 = vmatprep.subr.bf16.mxu0 %v678_v0  ;;  %v549_v19 = vpack.c.bf16 %v65_v17, %v64_v16  ;;  %v84_v21 = vld [vmem:[#allocation5 + $0xb8] sm:$0xff]  ;;  %v66_v22 = vld [vmem:[#allocation5 + $0x30] sm:$0xff]  ;;  %v743_v24 = vld [vmem:[#allocation2] sm:$0xff] }
  0x2c   :  { %545 = vmatprep.subr.bf16.mxu1 %v678_v0  ;;  %v67_v23 = vld [vmem:[#allocation5 + $0x38] sm:$0xff]  ;;  %v528_v25 = vpack.c.bf16 %v84_v21, %v83_v20  ;;  %v42_v26 = vld [vmem:[#allocation2 + $0x8] sm:$0xff]  ;;  %v44_v28 = vmul.f32 %v743_v24, %v743_v24  ;;  %v85_v30 = vld [vmem:[#allocation5 + $0xc0] sm:$0xff]  ;;  %p653_p5 = por %p652_p4, %p651_p3 }
  0x2d   :  { %v745_v27 = vld [vmem:[#allocation2 + $0x10] sm:$0xff]  ;;  %v552_v29 = vpack.c.bf16 %v67_v23, %v66_v22  ;;  %v86_v31 = vld [vmem:[#allocation5 + $0xc8] sm:$0xff]  ;;  %v45_v32 = vmul.f32 %v42_v26, %v42_v26  ;;  %v68_v34 = vld [vmem:[#allocation5 + $0x40] sm:$0xff] }
  0x2e   :  { %523 = vmatpush3.bf16.msra.mxu0 %v522_v12  ;;  %v47_v33 = vmul.f32 %v745_v27, %v745_v27  ;;  %v69_v35 = vld [vmem:[#allocation5 + $0x48] sm:$0xff]  ;;  %v531_v37 = vpack.c.bf16 %v86_v31, %v85_v30  ;;  %v87_v39 = vld [vmem:[#allocation5 + $0xd0] sm:$0xff]  ;;  %v88_v40 = vld [vmem:[#allocation5 + $0xd8] sm:$0xff]  ;;  %p654_p6 = pnand %p653_p5, %p647_p2 }
  0x2f   :  { %547 = vmatpush3.bf16.msra.mxu1 %v546_v13  ;;  %524 = vmatprep.subr.bf16.mxu0 %v678_v0  ;;  %v46_v36 = vadd.f32 %v45_v32, %v44_v28  ;;  %v555_v38 = vpack.c.bf16 %v69_v35, %v68_v34  ;;  %v70_v42 = vld [vmem:[#allocation5 + $0x50] sm:$0xff]  ;;  %v71_v43 = vld [vmem:[#allocation5 + $0x58] sm:$0xff]  ;;  %v534_v45 = vpack.c.bf16 %v88_v40, %v87_v39  ;;  %v89_v47 = vld [vmem:[#allocation5 + $0xe0] sm:$0xff] }
  0x30   :  { %548 = vmatprep.subr.bf16.mxu1 %v678_v0  ;;  %v558_v46 = vpack.c.bf16 %v71_v43, %v70_v42  ;;  %v90_v48 = vld [vmem:[#allocation5 + $0xe8] sm:$0xff]  ;;  %v72_v49 = vld [vmem:[#allocation5 + $0x60] sm:$0xff]  ;;  %v91_v53 = vld [vmem:[#allocation5 + $0xf0] sm:$0xff] }
  0x31   :  { %v48_v41 = vadd.f32 %v47_v33, %v46_v36  ;;  %v73_v50 = vld [vmem:[#allocation5 + $0x68] sm:$0xff]  ;;  %v537_v51 = vpack.c.bf16 %v90_v48, %v89_v47  ;;  %v92_v54 = vld [vmem:[#allocation5 + $0xf8] sm:$0xff]  ;;  %v74_v55 = vld [vmem:[#allocation5 + $0x70] sm:$0xff] }
  0x32   :  { %526 = vmatpush3.bf16.msra.mxu0 %v525_v18  ;;  %v561_v52 = vpack.c.bf16 %v73_v50, %v72_v49  ;;  %v75_v56 = vld [vmem:[#allocation5 + $0x78] sm:$0xff]  ;;  %v540_v57 = vpack.c.bf16 %v92_v54, %v91_v53  ;;  %v234_v59 = vld [vmem:[#allocation5 + $0x100] sm:$0xff]  ;;  %v235_v60 = vld [vmem:[#allocation5 + $0x108] sm:$0xff] }
  0x33   :  { %550 = vmatpush3.bf16.msra.mxu1 %v549_v19  ;;  %527 = vmatprep.subr.bf16.mxu0 %v678_v0  ;;  %v755_v44 = vmax.f32 %v48_v41, 1e-12  ;;  %v564_v58 = vpack.c.bf16 %v75_v56, %v74_v55  ;;  %v567_v63 = vpack.c.bf16 %v235_v60, %v234_v59  ;;  %v236_v4 = vld [vmem:[#allocation5 + $0x110] sm:$0xff]  ;;  %v237_v5 = vld [vmem:[#allocation5 + $0x118] sm:$0xff]  ;;  %v238_v7 = vld [vmem:[#allocation5 + $0x120] sm:$0xff] }
  0x34   :  { %551 = vmatprep.subr.bf16.mxu1 %v678_v0  ;;  %v570_v6 = vpack.c.bf16 %v237_v5, %v236_v4  ;;  %v239_v8 = vld [vmem:[#allocation5 + $0x128] sm:$0xff]  ;;  %v240_v10 = vld [vmem:[#allocation5 + $0x130] sm:$0xff]  ;;  %v241_v11 = vld [vmem:[#allocation5 + $0x138] sm:$0xff] }
  0x35   :  { %598 = vrsqrt.f32 %v755_v44  ;;  %v573_v9 = vpack.c.bf16 %v239_v8, %v238_v7  ;;  %v576_v12 = vpack.c.bf16 %v241_v11, %v240_v10  ;;  %v242_v13 = vld [vmem:[#allocation5 + $0x140] sm:$0xff]  ;;  %v243_v14 = vld [vmem:[#allocation5 + $0x148] sm:$0xff]  ;;  %v245_v16 = vld [vmem:[#allocation5 + $0x158] sm:$0xff]  ;;  %vm53_vm1 = vcmp.eq.f32.partialorder %v755_v44, inf }
  0x36   :  { %529 = vmatpush3.bf16.msra.mxu0 %v528_v25  ;;  %v579_v15 = vpack.c.bf16 %v243_v14, %v242_v13  ;;  %v246_v18 = vld [vmem:[#allocation5 + $0x160] sm:$0xff]  ;;  %v247_v19 = vld [vmem:[#allocation5 + $0x168] sm:$0xff]  ;;  %v248_v21 = vld [vmem:[#allocation5 + $0x170] sm:$0xff]  ;;  %v56_v32 = vand.u32 2147483648, %v755_v44  ;;  %vm55_vm2 = vcmp.eq.f32.partialorder %v755_v44, 0.0 }
  0x37   :  { %553 = vmatpush3.bf16.msra.mxu1 %v552_v29  ;;  %530 = vmatprep.subr.bf16.mxu0 %v678_v0  ;;  %v585_v20 = vpack.c.bf16 %v247_v19, %v246_v18  ;;  %v249_v22 = vld [vmem:[#allocation5 + $0x178] sm:$0xff] }
  0x38   :  { %554 = vmatprep.subr.bf16.mxu1 %v678_v0  ;;  %v588_v23 = vpack.c.bf16 %v249_v22, %v248_v21 }
  0x3a   :  { %532 = vmatpush3.bf16.msra.mxu0 %v531_v37 }
  0x3b   :  { %556 = vmatpush3.bf16.msra.mxu1 %v555_v38  ;;  %533 = vmatprep.subr.bf16.mxu0 %v678_v0  ;;  %v360_v38 = vld [vmem:[%s810_s2] ss:$0 sm:$0xff] }
  0x3c   :  { %557 = vmatprep.subr.bf16.mxu1 %v678_v0 }
  0x3e   :  { %535 = vmatpush3.bf16.msra.mxu0 %v534_v45 }
  0x3f   :  { %559 = vmatpush3.bf16.msra.mxu1 %v558_v46  ;;  %536 = vmatprep.subr.bf16.mxu0 %v678_v0  ;;  %v764_v61 = vpop.eup %598 }
  0x40   :  { %560 = vmatprep.subr.bf16.mxu1 %v678_v0  ;;  %v768_v62 = vmul.f32 %v764_v61, %v764_v61  ;;  %v52_v25 = vmul.f32 %v764_v61, %v755_v44  ;;  %v329_v45 = vmul.f32 -398600.44, %v764_v61 }
  0x42   :  { %538 = vmatpush3.bf16.msra.mxu0 %v537_v51  ;;  %v76_v2 = vmul.f32 %v768_v62, %v42_v26  ;;  %v59_v3 = vmul.f32 %v768_v62, %v743_v24  ;;  %v233_v24 = vmul.f32 %v768_v62, %v745_v27  ;;  %v54_v33 = vsel %vm53_vm1, %v755_v44, %v52_v25 }
  0x43   :  { %562 = vmatpush3.bf16.msra.mxu1 %v561_v52  ;;  %539 = vmatprep.subr.bf16.mxu0 %v678_v0  ;;  %v330_v40 = vmul.f32 2.56e+08, %v768_v62 }
  0x44   :  { %563 = vmatprep.subr.bf16.mxu1 %v678_v0 }
  0x46   :  { %541 = vmatpush3.bf16.msra.mxu0 %v540_v57 }
  0x47   :  { %565 = vmatpush3.bf16.msra.mxu1 %v564_v58  ;;  %566 = vmatprep.subr.bf16.mxu0 %v678_v0 }
  0x49   :  { %446 = vmatmul.mubr.f32.vlgmr.msra.gmra.mrb[0].mxu0 %v76_v2 }
  0x4a   :  { %481 = vmatmul.mubr.f32.vlgmr.msra.gmra.mrb[0].mxu1 %v59_v3  ;;  %568 = vmatpush3.bf16.msra.mxu0 %v567_v63 }
  0x4b   :  { %515 = vmatprep.mubr.msk.f32.mxu0 %vm679_vm0, %v680_v1  ;;  %569 = vmatprep.subr.bf16.mxu0 %v678_v0  ;;  %v244_v1 = vld [vmem:[#allocation5 + $0x150] sm:$0xff] }
  0x4c   :  { %v582_v17 = vpack.c.bf16 %v245_v16, %v244_v1 }
  0x4e   :  { %571 = vmatpush3.bf16.msra.mxu0 %v570_v6 }
  0x4f   :  { %572 = vmatprep.subr.bf16.mxu0 %v678_v0 }
  0x52   :  { %574 = vmatpush3.bf16.msra.mxu0 %v573_v9 }
  0x53   :  { %575 = vmatprep.subr.bf16.mxu0 %v678_v0 }
  0x56   :  { %577 = vmatpush3.bf16.msra.mxu0 %v576_v12 }
  0x57   :  { %578 = vmatprep.subr.bf16.mxu0 %v678_v0 }
  0x5a   :  { %580 = vmatpush3.bf16.msra.mxu0 %v579_v15 }
  0x5b   :  { %581 = vmatprep.subr.bf16.mxu0 %v678_v0 }
  0x5e   :  { %583 = vmatpush3.bf16.msra.mxu0 %v582_v17 }
  0x5f   :  { %584 = vmatprep.subr.bf16.mxu0 %v678_v0 }
  0x62   :  { %586 = vmatpush3.bf16.msra.mxu0 %v585_v20 }
  0x63   :  { %587 = vmatprep.subr.bf16.mxu0 %v678_v0  ;;  %v57_v0 = vsel %vm55_vm2, %v56_v32, %v54_v33 }
  0x64   :  { %v361_v27 = vadd.f32 -16000.0, %v57_v0 }
  0x66   :  { %589 = vmatpush3.bf16.msra.mxu0 %v588_v23  ;;  %v335_v34 = vmul.f32 6.25e-05, %v361_v27 }
  0x68   :  { %600 = vtanh.f32 %v335_v34 }
  0x69   :  { %516 = vmatmul.mubr.f32.vlgmr.msra.gmra.mrb[2].mxu0 %v233_v24 }
  0x72   :  { %v601_v35 = vpop.eup %600 }
  0x73   :  { %v337_v36 = vadd.f32 1.0, %v601_v35 }
  0x75   :  { %v338_v42 = vmul.f32 0.5, %v337_v36 }
  0x77   :  { %v339_v46 = vsub.f32 1.0, %v338_v42  ;;  %v341_v48 = vmul.f32 %v338_v42, %v329_v45 }
 0x11c   :  { %v159_v26 = vpop.f32.mrb[0].mxu0 }
 0x11d   :  { %v229_v28 = vpop.f32.mrb[0].mxu1  ;;  %v447_v29 = vpop.f32.mrb[1].mxu0 }
 0x11e   :  { %v230_v30 = vadd.f32 %v229_v28, %v159_v26  ;;  %v482_v31 = vpop.f32.mrb[1].mxu1 }
 0x13c   :  { %v316_v37 = vpop.f32.mrb[2].mxu0 }
 0x13d   :  { %v320_v39 = vadd.f32 %v316_v37, %v230_v30  ;;  %v517_v41 = vpop.f32.mrb[3].mxu0 }
 0x13f   :  { %v328_v43 = vadd.f32 %v360_v38, %v320_v39 }
 0x141   :  { %v331_v44 = vmul.f32 %v330_v40, %v328_v43 }
 0x143   :  { %v332_v47 = vadd.f32 %v331_v44, %v329_v45 }
 0x145   :  { %v340_v49 = vmul.f32 %v339_v46, %v332_v47 }
 0x147   :  { %v342_v50 = vadd.f32 %v341_v48, %v340_v49 }
 0x149   :  { %343 = vst [vmem:[#allocation7] sm:$0xff] %v342_v50 }
 0x14a   :  { %657 = shalt.err (!%p654_p6)
}
 0x14b   :  { %s658_s15 = scalar_lea.hbm %s811_s3, 128 }
 0x14c   :  { %p659_p7 = scmp.ne.s32.totalorder %s811_s3, %s658_s15  ;;  %p662_p8 = scmp.lt.u32.totalorder %s658_s15, %s811_s3 }
 0x14e   :  { %p664_p9 = pnand %p662_p8, %p659_p7 }
 0x150   :  { %667 = shalt.err (!%p664_p9)
}
 0x151   :  { %353 = dma.vmem_to_hbm [thread:$0]  %s351_s12, 128, %s811_s3, [#allocation4]  }
 0x152   :  { %672 = dma.done.wait [#allocation4], 128  }
 0x153   :  { %673 = vsyncadd [#allocation4], 4294967168 }
 0x154   :  { %357 = vsyncpa [#allocation3], 1 }
 0x155   :  { %358 = vsyncpa [#allocation6], 1 }
 0x156   :  { %359 = vsyncpa [#allocation4], 1 }

</bundles_post_ra>
